<compile_context>
chip_gen: v7x
topology: tpu7x:2x2x1
jax: 0.10.0
libtpu: 0.0.40
codegen_flags: <defaults>
</compile_context>

<pallas_src>
import functools

import jax
import jax.numpy as jnp
from jax.experimental import pallas as pl
from jax.experimental.pallas import tpu as pltpu


def _round_up(x, m):
    return (x + m - 1) // m * m


def _cdiv(a, b):
    return -(-a // b)


# --------------------------------------------------------------------------
# Kernel
# --------------------------------------------------------------------------
def _learn_pose_kernel(rt_ref, out_ref):
    # rt_ref : (6, 8, LB) f32  rows 0-2 = r, rows 3-5 = t (cameras on sublane x lane)
    # out_ref: (12, 8, LB) f32 row e = element e of the row-major flattened
    #                          top 3x4 block of c2w ( [R | t] ).
    rx = rt_ref[0]
    ry = rt_ref[1]
    rz = rt_ref[2]
    tx = rt_ref[3]
    ty = rt_ref[4]
    tz = rt_ref[5]

    rx2, ry2, rz2 = rx * rx, ry * ry, rz * rz
    rxy, rxz, ryz = rx * ry, rx * rz, ry * rz

    # Rodrigues coefficients via rsqrt (EUP) + half-angle (cancellation-free):
    #   a = sin|r| / |r| ,  b = (1 - cos|r|) / |r|^2
    n2 = rx2 + ry2 + rz2
    inv_n = jax.lax.rsqrt(n2 + 1e-30)          # EUP slot
    inv_n2 = inv_n * inv_n
    n = n2 * inv_n                             # ~= |r|
    h = 0.5 * n
    sh = jnp.sin(h)                            # EUP
    ch = jnp.cos(h)                            # EUP
    a = (2.0 * sh * ch) * inv_n                # sin(n)/n
    b = (2.0 * sh * sh) * inv_n2               # (1-cos(n))/n^2

    a_rx, a_ry, a_rz = a * rx, a * ry, a * rz
    b_xy, b_xz, b_yz = b * rxy, b * rxz, b * ryz
    one = jnp.ones_like(rx)

    # R = I + a*K + b*K@K with K = skew(r), element-wise closed form.
    out_ref[0] = one - b * (ry2 + rz2)   # (0,0)
    out_ref[1] = b_xy - a_rz             # (0,1)
    out_ref[2] = b_xz + a_ry             # (0,2)
    out_ref[3] = tx                      # (0,3)
    out_ref[4] = b_xy + a_rz             # (1,0)
    out_ref[5] = one - b * (rx2 + rz2)   # (1,1)
    out_ref[6] = b_yz - a_rx             # (1,2)
    out_ref[7] = ty                      # (1,3)
    out_ref[8] = b_xz - a_ry             # (2,0)
    out_ref[9] = b_yz + a_rx             # (2,1)
    out_ref[10] = one - b * (rx2 + ry2)  # (2,2)
    out_ref[11] = tz                     # (2,3)
    # Bottom row [0 0 0 1] is constant and supplied by the wrapper.


def _pose_pallas(rt, lane_block, n_tiles):
    """rt: (6, n_tiles*8, lane_block) f32 -> (12, n_tiles*8, lane_block) f32."""
    return pl.pallas_call(
        _learn_pose_kernel,
        out_shape=jax.ShapeDtypeStruct((12, n_tiles * 8, lane_block), jnp.float32),
        grid=(n_tiles,),
        in_specs=[pl.BlockSpec((6, 8, lane_block), lambda i: (0, i, 0))],
        out_specs=pl.BlockSpec((12, 8, lane_block), lambda i: (0, i, 0)),
        compiler_params=pltpu.CompilerParams(
            dimension_semantics=("parallel",)),
    )(rt)


# --------------------------------------------------------------------------
# Wrapper glue (packing / unpacking, gather, constant bottom row)
# --------------------------------------------------------------------------
def _choose_lane_block(B):
    # One grid step holds 8 * lane_block cameras.  Aim for >= 2 grid steps
    # once the batch is large enough (v7x megacore), cap the lane block so
    # per-step tiles stay modest, never go below the 128-lane minimum.
    per_tile = _round_up(_cdiv(max(B, 1), 2), 8 * 128)
    return int(min(max(per_tile // 8, 128), 2048))


def _pack_rt(r_sel, t_sel, lane_block):
    """(B,3),(B,3) -> (6, n_tiles*8, lane_block) lane/sublane-packed input."""
    B = r_sel.shape[0]
    cams_per_tile = 8 * lane_block
    n_tiles = max(_cdiv(B, cams_per_tile), 1)
    b_pad = n_tiles * cams_per_tile
    rt = jnp.concatenate([r_sel, t_sel], axis=1)            # (B, 6)
    if b_pad != B:
        rt = jnp.pad(rt, ((0, b_pad - B), (0, 0)))
    # (B_pad, 6) -> (n_tiles, 8, lane_block, 6) -> (6, n_tiles*8, lane_block)
    rt = rt.reshape(n_tiles, 8, lane_block, 6).transpose(3, 0, 1, 2)
    rt = rt.reshape(6, n_tiles * 8, lane_block)
    return rt, n_tiles


def _unpack_c2w(packed, B, lane_block, n_tiles):
    """(12, n_tiles*8, lane_block) packed kernel output -> (B, 4, 4)."""
    top = packed.reshape(12, n_tiles, 8, lane_block).transpose(1, 2, 3, 0)
    top = top.reshape(n_tiles * 8 * lane_block, 3, 4)[:B]    # (B, 3, 4) = [R|t]
    bottom = jnp.broadcast_to(
        jnp.array([[[0.0, 0.0, 0.0, 1.0]]], dtype=jnp.float32), (B, 1, 4))
    return jnp.concatenate([top, bottom], axis=1)            # (B, 4, 4)


def learn_pose_forward_packed(cam_ids, r, t, lane_block=None):
    """Batched forward returning the raw lane/sublane-packed kernel output.

    Returns (packed, n_tiles, lane_block) where packed has shape
    (12, n_tiles*8, lane_block); camera b lives at
      (tile = b // (8*lane_block), sublane = (b // lane_block) % 8,
       lane = b % lane_block)
    and row e is element e of the row-major flattened [R|t].  Cameras past B
    are zero-rotation / zero-translation padding; consumers must ignore them.
    Prefer this layout when fusing into a downstream Pallas kernel.
    """
    r = jnp.asarray(r, jnp.float32)
    t = jnp.asarray(t, jnp.float32)
    if cam_ids is None:                      # fast path: all cameras, no gather
        r_sel, t_sel = r, t
        B = int(r.shape[0])
    else:
        cam_ids = jnp.atleast_1d(jnp.asarray(cam_ids, jnp.int32))
        B = int(cam_ids.shape[0])
        r_sel = jnp.take(r, cam_ids, axis=0)
        t_sel = jnp.take(t, cam_ids, axis=0)
    if lane_block is None:
        lane_block = _choose_lane_block(B)
    rt, n_tiles = _pack_rt(r_sel, t_sel, lane_block)
    return _pose_pallas(rt, lane_block, n_tiles), n_tiles, lane_block


def learn_pose_forward(cam_id, r, t, lane_block=None):
    """API parity with LearnPose.forward.

    cam_id: scalar -> (4,4); 1-D vector -> (B,4,4); None -> all cameras
    (no gather, the common NeRFmm "optimize every pose" case).
    """
    scalar = cam_id is not None and jnp.ndim(cam_id) == 0
    if cam_id is None:
        B = int(jnp.asarray(r).shape[0])
        packed, n_tiles, lb = learn_pose_forward_packed(None, r, t, lane_block)
    else:
        cam_vec = jnp.atleast_1d(jnp.asarray(cam_id, jnp.int32))
        B = int(cam_vec.shape[0])
        packed, n_tiles, lb = learn_pose_forward_packed(cam_vec, r, t, lane_block)
    c2w = _unpack_c2w(packed, B, lb, n_tiles)
    return c2w[0] if scalar else c2w


# --------------------------------------------------------------------------
# Pure-JAX reference (mirrors NeRFmm make_c2w / Exp / vec2skew)
# --------------------------------------------------------------------------
def _make_c2w_ref(r, t):
    rx, ry, rz = r[0], r[1], r[2]
    K = jnp.array([[0.0, -rz, ry],
                   [rz, 0.0, -rx],
                   [-ry, rx, 0.0]], dtype=jnp.float32)
    n = jnp.sqrt(jnp.sum(r * r)) + 1e-15
    R = (jnp.eye(3, dtype=jnp.float32)
         + (jnp.sin(n) / n) * K
         + ((1.0 - jnp.cos(n)) / (n * n)) * (K @ K))
    c2w = jnp.concatenate([R, t[:, None]], axis=1)
    bottom = jnp.array([[0.0, 0.0, 0.0, 1.0]], dtype=jnp.float32)
    return jnp.concatenate([c2w, bottom], axis=0)


if __name__ == "__main__":
    num_cams = 8
    key = jax.random.PRNGKey(0)
    kr, kt = jax.random.split(key)
    # nn.Parameter init in the module is zeros; use small deterministic values
    # so the Rodrigues path is exercised non-trivially.
    r_params = 0.1 * jax.random.normal(kr, (num_cams, 3), dtype=jnp.float32)
    t_params = jax.random.normal(kt, (num_cams, 3), dtype=jnp.float32)

    ref_all = jnp.stack([_make_c2w_ref(r_params[i], t_params[i])
                         for i in range(num_cams)])

    # 1) All-cameras fast path (no gather).
    c2w_all = jax.block_until_ready(learn_pose_forward(None, r_params, t_params))
    assert c2w_all.shape == (num_cams, 4, 4) and c2w_all.dtype == jnp.float32
    assert jnp.allclose(c2w_all, ref_all, atol=1e-5, rtol=1e-5), (c2w_all, ref_all)

    # 2) Explicit cam_id vector (gather path).
    cam_ids = jnp.arange(num_cams, dtype=jnp.int32)
    c2w_vec = jax.block_until_ready(learn_pose_forward(cam_ids, r_params, t_params))
    assert jnp.allclose(c2w_vec, ref_all, atol=1e-5, rtol=1e-5)

    # 3) Single-camera parity with the original module API.
    c2w_3 = jax.block_until_ready(learn_pose_forward(3, r_params, t_params))
    assert c2w_3.shape == (4, 4) and c2w_3.dtype == jnp.float32
    assert jnp.allclose(c2w_3, ref_all[3], atol=1e-5, rtol=1e-5)

    # 4) Zero-rotation (the module's init state): R must be exactly identity.
    r_zero = jnp.zeros((num_cams, 3), dtype=jnp.float32)
    c2w_zero = jax.block_until_ready(learn_pose_forward(None, r_zero, t_params))
    assert jnp.allclose(c2w_zero[:, :3, :3],
                        jnp.broadcast_to(jnp.eye(3, dtype=jnp.float32),
                                         (num_cams, 3, 3)),
                        atol=1e-7)
    assert jnp.allclose(c2w_zero[:, :3, 3], t_params, atol=1e-7)

    print("KERNEL_OK")
</pallas_src>

<mosaic_0001>
module attributes {stable_mosaic.version = 11 : i64} {
  func.func @_learn_pose_kernel(%arg0: i32, %arg1: memref<6x8x128xf32, #tpu.memory_space<vmem>>, %arg2: memref<12x8x128xf32, #tpu.memory_space<vmem>>) attributes {dimension_semantics = [#tpu.dimension_semantics<parallel>], iteration_bounds = array<i64: 1>, scalar_prefetch = 0 : i64, scratch_operands = 0 : i64, tpu.core_type = #tpu.core_type<tc>, window_params = [{transform_indices = @transform_0, window_bounds = array<i64: 6, 8, 128>}, {transform_indices = @transform_1, window_bounds = array<i64: 12, 8, 128>}]} {
    %c0 = arith.constant 0 : index
    %c0_0 = arith.constant 0 : index
    %c0_1 = arith.constant 0 : index
    %0 = vector.load %arg1[%c0, %c0_0, %c0_1] : memref<6x8x128xf32, #tpu.memory_space<vmem>>, vector<1x8x128xf32>
    %1 = vector.shape_cast %0 : vector<1x8x128xf32> to vector<8x128xf32>
    %c1 = arith.constant 1 : index
    %c0_2 = arith.constant 0 : index
    %c0_3 = arith.constant 0 : index
    %2 = vector.load %arg1[%c1, %c0_2, %c0_3] : memref<6x8x128xf32, #tpu.memory_space<vmem>>, vector<1x8x128xf32>
    %3 = vector.shape_cast %2 : vector<1x8x128xf32> to vector<8x128xf32>
    %c2 = arith.constant 2 : index
    %c0_4 = arith.constant 0 : index
    %c0_5 = arith.constant 0 : index
    %4 = vector.load %arg1[%c2, %c0_4, %c0_5] : memref<6x8x128xf32, #tpu.memory_space<vmem>>, vector<1x8x128xf32>
    %5 = vector.shape_cast %4 : vector<1x8x128xf32> to vector<8x128xf32>
    %c3 = arith.constant 3 : index
    %c0_6 = arith.constant 0 : index
    %c0_7 = arith.constant 0 : index
    %6 = vector.load %arg1[%c3, %c0_6, %c0_7] : memref<6x8x128xf32, #tpu.memory_space<vmem>>, vector<1x8x128xf32>
    %7 = vector.shape_cast %6 : vector<1x8x128xf32> to vector<8x128xf32>
    %c4 = arith.constant 4 : index
    %c0_8 = arith.constant 0 : index
    %c0_9 = arith.constant 0 : index
    %8 = vector.load %arg1[%c4, %c0_8, %c0_9] : memref<6x8x128xf32, #tpu.memory_space<vmem>>, vector<1x8x128xf32>
    %9 = vector.shape_cast %8 : vector<1x8x128xf32> to vector<8x128xf32>
    %c5 = arith.constant 5 : index
    %c0_10 = arith.constant 0 : index
    %c0_11 = arith.constant 0 : index
    %10 = vector.load %arg1[%c5, %c0_10, %c0_11] : memref<6x8x128xf32, #tpu.memory_space<vmem>>, vector<1x8x128xf32>
    %11 = vector.shape_cast %10 : vector<1x8x128xf32> to vector<8x128xf32>
    %12 = arith.mulf %1, %1 : vector<8x128xf32>
    %13 = arith.mulf %3, %3 : vector<8x128xf32>
    %14 = arith.mulf %5, %5 : vector<8x128xf32>
    %15 = arith.mulf %1, %3 : vector<8x128xf32>
    %16 = arith.mulf %1, %5 : vector<8x128xf32>
    %17 = arith.mulf %3, %5 : vector<8x128xf32>
    %18 = arith.addf %12, %13 : vector<8x128xf32>
    %19 = arith.addf %18, %14 : vector<8x128xf32>
    %cst = arith.constant 1.000000e-30 : f32
    %20 = vector.broadcast %cst : f32 to vector<8x128xf32>
    %21 = arith.addf %19, %20 : vector<8x128xf32>
    %22 = math.rsqrt %21 : vector<8x128xf32>
    %23 = arith.mulf %22, %22 : vector<8x128xf32>
    %24 = arith.mulf %19, %22 : vector<8x128xf32>
    %cst_12 = arith.constant 5.000000e-01 : f32
    %25 = vector.broadcast %cst_12 : f32 to vector<8x128xf32>
    %26 = arith.mulf %25, %24 : vector<8x128xf32>
    %27 = math.sin %26 : vector<8x128xf32>
    %28 = math.cos %26 : vector<8x128xf32>
    %cst_13 = arith.constant 2.000000e+00 : f32
    %29 = vector.broadcast %cst_13 : f32 to vector<8x128xf32>
    %30 = arith.mulf %29, %27 : vector<8x128xf32>
    %31 = arith.mulf %30, %28 : vector<8x128xf32>
    %32 = arith.mulf %31, %22 : vector<8x128xf32>
    %cst_14 = arith.constant 2.000000e+00 : f32
    %33 = vector.broadcast %cst_14 : f32 to vector<8x128xf32>
    %34 = arith.mulf %33, %27 : vector<8x128xf32>
    %35 = arith.mulf %34, %27 : vector<8x128xf32>
    %36 = arith.mulf %35, %23 : vector<8x128xf32>
    %37 = arith.mulf %32, %1 : vector<8x128xf32>
    %38 = arith.mulf %32, %3 : vector<8x128xf32>
    %39 = arith.mulf %32, %5 : vector<8x128xf32>
    %40 = arith.mulf %36, %15 : vector<8x128xf32>
    %41 = arith.mulf %36, %16 : vector<8x128xf32>
    %42 = arith.mulf %36, %17 : vector<8x128xf32>
    %cst_15 = arith.constant 1.000000e+00 : f32
    %43 = vector.broadcast %cst_15 : f32 to vector<8x128xf32>
    %44 = arith.addf %13, %14 : vector<8x128xf32>
    %45 = arith.mulf %36, %44 : vector<8x128xf32>
    %46 = arith.subf %43, %45 : vector<8x128xf32>
    %c0_16 = arith.constant 0 : index
    %c0_17 = arith.constant 0 : index
    %c0_18 = arith.constant 0 : index
    %47 = vector.load %arg2[%c0_16, %c0_17, %c0_18] : memref<12x8x128xf32, #tpu.memory_space<vmem>>, vector<1x8x128xf32>
    %48 = vector.shape_cast %47 : vector<1x8x128xf32> to vector<8x128xf32>
    %49 = vector.shape_cast %46 : vector<8x128xf32> to vector<1x8x128xf32>
    tpu.vector_store %arg2[%c0_16, %c0_17, %c0_18], %49 {strides = array<i32>} : memref<12x8x128xf32, #tpu.memory_space<vmem>>, vector<1x8x128xf32>,
    %50 = arith.subf %40, %39 : vector<8x128xf32>
    %c1_19 = arith.constant 1 : index
    %c0_20 = arith.constant 0 : index
    %c0_21 = arith.constant 0 : index
    %51 = vector.load %arg2[%c1_19, %c0_20, %c0_21] : memref<12x8x128xf32, #tpu.memory_space<vmem>>, vector<1x8x128xf32>
    %52 = vector.shape_cast %51 : vector<1x8x128xf32> to vector<8x128xf32>
    %53 = vector.shape_cast %50 : vector<8x128xf32> to vector<1x8x128xf32>
    tpu.vector_store %arg2[%c1_19, %c0_20, %c0_21], %53 {strides = array<i32>} : memref<12x8x128xf32, #tpu.memory_space<vmem>>, vector<1x8x128xf32>,
    %54 = arith.addf %41, %38 : vector<8x128xf32>
    %c2_22 = arith.constant 2 : index
    %c0_23 = arith.constant 0 : index
    %c0_24 = arith.constant 0 : index
    %55 = vector.load %arg2[%c2_22, %c0_23, %c0_24] : memref<12x8x128xf32, #tpu.memory_space<vmem>>, vector<1x8x128xf32>
    %56 = vector.shape_cast %55 : vector<1x8x128xf32> to vector<8x128xf32>
    %57 = vector.shape_cast %54 : vector<8x128xf32> to vector<1x8x128xf32>
    tpu.vector_store %arg2[%c2_22, %c0_23, %c0_24], %57 {strides = array<i32>} : memref<12x8x128xf32, #tpu.memory_space<vmem>>, vector<1x8x128xf32>,
    %c3_25 = arith.constant 3 : index
    %c0_26 = arith.constant 0 : index
    %c0_27 = arith.constant 0 : index
    %58 = vector.load %arg2[%c3_25, %c0_26, %c0_27] : memref<12x8x128xf32, #tpu.memory_space<vmem>>, vector<1x8x128xf32>
    %59 = vector.shape_cast %58 : vector<1x8x128xf32> to vector<8x128xf32>
    %60 = vector.shape_cast %7 : vector<8x128xf32> to vector<1x8x128xf32>
    tpu.vector_store %arg2[%c3_25, %c0_26, %c0_27], %60 {strides = array<i32>} : memref<12x8x128xf32, #tpu.memory_space<vmem>>, vector<1x8x128xf32>,
    %61 = arith.addf %40, %39 : vector<8x128xf32>
    %c4_28 = arith.constant 4 : index
    %c0_29 = arith.constant 0 : index
    %c0_30 = arith.constant 0 : index
    %62 = vector.load %arg2[%c4_28, %c0_29, %c0_30] : memref<12x8x128xf32, #tpu.memory_space<vmem>>, vector<1x8x128xf32>
    %63 = vector.shape_cast %62 : vector<1x8x128xf32> to vector<8x128xf32>
    %64 = vector.shape_cast %61 : vector<8x128xf32> to vector<1x8x128xf32>
    tpu.vector_store %arg2[%c4_28, %c0_29, %c0_30], %64 {strides = array<i32>} : memref<12x8x128xf32, #tpu.memory_space<vmem>>, vector<1x8x128xf32>,
    %65 = arith.addf %12, %14 : vector<8x128xf32>
    %66 = arith.mulf %36, %65 : vector<8x128xf32>
    %67 = arith.subf %43, %66 : vector<8x128xf32>
    %c5_31 = arith.constant 5 : index
    %c0_32 = arith.constant 0 : index
    %c0_33 = arith.constant 0 : index
    %68 = vector.load %arg2[%c5_31, %c0_32, %c0_33] : memref<12x8x128xf32, #tpu.memory_space<vmem>>, vector<1x8x128xf32>
    %69 = vector.shape_cast %68 : vector<1x8x128xf32> to vector<8x128xf32>
    %70 = vector.shape_cast %67 : vector<8x128xf32> to vector<1x8x128xf32>
    tpu.vector_store %arg2[%c5_31, %c0_32, %c0_33], %70 {strides = array<i32>} : memref<12x8x128xf32, #tpu.memory_space<vmem>>, vector<1x8x128xf32>,
    %71 = arith.subf %42, %37 : vector<8x128xf32>
    %c6 = arith.constant 6 : index
    %c0_34 = arith.constant 0 : index
    %c0_35 = arith.constant 0 : index
    %72 = vector.load %arg2[%c6, %c0_34, %c0_35] : memref<12x8x128xf32, #tpu.memory_space<vmem>>, vector<1x8x128xf32>
    %73 = vector.shape_cast %72 : vector<1x8x128xf32> to vector<8x128xf32>
    %74 = vector.shape_cast %71 : vector<8x128xf32> to vector<1x8x128xf32>
    tpu.vector_store %arg2[%c6, %c0_34, %c0_35], %74 {strides = array<i32>} : memref<12x8x128xf32, #tpu.memory_space<vmem>>, vector<1x8x128xf32>,
    %c7 = arith.constant 7 : index
    %c0_36 = arith.constant 0 : index
    %c0_37 = arith.constant 0 : index
    %75 = vector.load %arg2[%c7, %c0_36, %c0_37] : memref<12x8x128xf32, #tpu.memory_space<vmem>>, vector<1x8x128xf32>
    %76 = vector.shape_cast %75 : vector<1x8x128xf32> to vector<8x128xf32>
    %77 = vector.shape_cast %9 : vector<8x128xf32> to vector<1x8x128xf32>
    tpu.vector_store %arg2[%c7, %c0_36, %c0_37], %77 {strides = array<i32>} : memref<12x8x128xf32, #tpu.memory_space<vmem>>, vector<1x8x128xf32>,
    %78 = arith.subf %41, %38 : vector<8x128xf32>
    %c8 = arith.constant 8 : index
    %c0_38 = arith.constant 0 : index
    %c0_39 = arith.constant 0 : index
    %79 = vector.load %arg2[%c8, %c0_38, %c0_39] : memref<12x8x128xf32, #tpu.memory_space<vmem>>, vector<1x8x128xf32>
    %80 = vector.shape_cast %79 : vector<1x8x128xf32> to vector<8x128xf32>
    %81 = vector.shape_cast %78 : vector<8x128xf32> to vector<1x8x128xf32>
    tpu.vector_store %arg2[%c8, %c0_38, %c0_39], %81 {strides = array<i32>} : memref<12x8x128xf32, #tpu.memory_space<vmem>>, vector<1x8x128xf32>,
    %82 = arith.addf %42, %37 : vector<8x128xf32>
    %c9 = arith.constant 9 : index
    %c0_40 = arith.constant 0 : index
    %c0_41 = arith.constant 0 : index
    %83 = vector.load %arg2[%c9, %c0_40, %c0_41] : memref<12x8x128xf32, #tpu.memory_space<vmem>>, vector<1x8x128xf32>
    %84 = vector.shape_cast %83 : vector<1x8x128xf32> to vector<8x128xf32>
    %85 = vector.shape_cast %82 : vector<8x128xf32> to vector<1x8x128xf32>
    tpu.vector_store %arg2[%c9, %c0_40, %c0_41], %85 {strides = array<i32>} : memref<12x8x128xf32, #tpu.memory_space<vmem>>, vector<1x8x128xf32>,
    %86 = arith.addf %12, %13 : vector<8x128xf32>
    %87 = arith.mulf %36, %86 : vector<8x128xf32>
    %88 = arith.subf %43, %87 : vector<8x128xf32>
    %c10 = arith.constant 10 : index
    %c0_42 = arith.constant 0 : index
    %c0_43 = arith.constant 0 : index
    %89 = vector.load %arg2[%c10, %c0_42, %c0_43] : memref<12x8x128xf32, #tpu.memory_space<vmem>>, vector<1x8x128xf32>
    %90 = vector.shape_cast %89 : vector<1x8x128xf32> to vector<8x128xf32>
    %91 = vector.shape_cast %88 : vector<8x128xf32> to vector<1x8x128xf32>
    tpu.vector_store %arg2[%c10, %c0_42, %c0_43], %91 {strides = array<i32>} : memref<12x8x128xf32, #tpu.memory_space<vmem>>, vector<1x8x128xf32>,
    %c11 = arith.constant 11 : index
    %c0_44 = arith.constant 0 : index
    %c0_45 = arith.constant 0 : index
    %92 = vector.load %arg2[%c11, %c0_44, %c0_45] : memref<12x8x128xf32, #tpu.memory_space<vmem>>, vector<1x8x128xf32>
    %93 = vector.shape_cast %92 : vector<1x8x128xf32> to vector<8x128xf32>
    %94 = vector.shape_cast %11 : vector<8x128xf32> to vector<1x8x128xf32>
    tpu.vector_store %arg2[%c11, %c0_44, %c0_45], %94 {strides = array<i32>} : memref<12x8x128xf32, #tpu.memory_space<vmem>>, vector<1x8x128xf32>,
    return
  }
  func.func @transform_0(%arg0: i32) -> (i32, i32, i32) {
    %c0_i32 = arith.constant 0 : i32
    %c0_i32_0 = arith.constant 0 : i32
    %c0_i32_1 = arith.constant 0 : i32
    return %c0_i32, %arg0, %c0_i32_0 : i32, i32, i32
  }
  func.func @transform_1(%arg0: i32) -> (i32, i32, i32) {
    %c0_i32 = arith.constant 0 : i32
    %c0_i32_0 = arith.constant 0 : i32
    %c0_i32_1 = arith.constant 0 : i32
    return %c0_i32, %arg0, %c0_i32_0 : i32, i32, i32
  }
}

</mosaic_0001>

<bundles_post_ra>
// kernel: tpu_custom_call.1
= control target key start
LH: loop header
LB: loop body
LE: loop exit
PB: predicated region body
PF: predicated region fallthrough
CT: control target
= control target key end

     0   :  { %6 = vsyncpa [#allocation3], 0  ;;  %s503_s0 = inlined_call_operand.hbm [shape: f32[6,8,128], index: 0, kind: input, shape index: {}]   ;;  %s504_s1 = inlined_call_operand.hbm [shape: f32[12,8,128], index: 1, kind: output, shape index: {}]  }
   0x1   :  { %7 = vsyncpa [#allocation4], 0  ;;  %s395_s6 = smov [#allocation2]   ;;  %s347_s10 = scalar_lea.hbm %s503_s0, 768 }
   0x2   :  { %s13_s7 = sshll.u32 %s395_s6, 4  ;;  %p348_p0 = scmp.ne.s32.totalorder %s503_s0, %s347_s10  ;;  %s14_s7 = int_to_ptr.vmem [resolvable:$true] %s13_s7 }
   0x3   :  { %p351_p1 = scmp.lt.u32.totalorder %s347_s10, %s503_s0 }
   0x5   :  { %p353_p2 = pnand %p351_p1, %p348_p0 }
   0x7   :  { %356 = shalt.err (!%p353_p2)
}
   0x8   :  { %s357_s15 = scalar_lea.vmem %s14_s7, 768  ;;  %p362_p4 = scmp.lt.s32.totalorder %s14_s7, %s14_s7 }
   0x9   :  { %p358_p3 = scmp.ne.s32.totalorder %s14_s7, %s357_s15  ;;  %p363_p5 = scmp.lt.s32.totalorder %s357_s15, %s357_s15 }
   0xb   :  { %p364_p6 = por %p363_p5, %p362_p4 }
   0xd   :  { %p365_p7 = pnand %p364_p6, %p358_p3 }
   0xf   :  { %368 = shalt.err (!%p365_p7)
}
  0x10   :  { %s396_s16 = smov 128   ;;  %s397_s17 = smov 8  }
  0x11   :  { %19 = dma.hbm_to_vmem [thread:$0]  %s503_s0, 768, %s14_s7, [#allocation3], %s396_s16, %s396_s16, %s397_s17  }
  0x12   :  { %391 = dma.done.wait [#allocation3], 768  }
  0x13   :  { %392 = vsyncadd [#allocation3], 4294966528  ;;  %v430_v0 = vld [vmem:[#allocation2] sm:$0xff]  ;;  %v432_v1 = vld [vmem:[#allocation2 + $0x8] sm:$0xff]  ;;  %v398_v28 = vmov 683565275  }
  0x14   :  { %v434_v2 = vld [vmem:[#allocation2 + $0x10] sm:$0xff]  ;;  %v34_v3 = vmul.f32 %v430_v0, %v430_v0  ;;  %v35_v4 = vmul.f32 %v432_v1, %v432_v1  ;;  %v29_v6 = vld [vmem:[#allocation2 + $0x18] sm:$0xff]  ;;  %v31_v7 = vld [vmem:[#allocation2 + $0x20] sm:$0xff]  ;;  %v399_v30 = vmov 2475754826   ;;  %s404_s0 = smov [#allocation5]  }
  0x15   :  { %v36_v5 = vmul.f32 %v434_v2, %v434_v2  ;;  %v33_v8 = vld [vmem:[#allocation2 + $0x28] sm:$0xff]  ;;  %276 = vst [vmem:[#allocation5 + $0x18] sm:$0xff] %v29_v6  ;;  %289 = vst [vmem:[#allocation5 + $0x38] sm:$0xff] %v31_v7  ;;  %v400_v32 = vmov 2131351028   ;;  %s307_s20 = sshll.u32 %s404_s0, 4  ;;  %s308_s20 = int_to_ptr.vmem [resolvable:$true] %s307_s20 }
  0x16   :  { %301 = vst [vmem:[#allocation5 + $0x58] sm:$0xff] %v33_v8  ;;  %v442_v9 = vadd.f32 %v35_v4, %v34_v3  ;;  %v401_v34 = vmov 2102212464   ;;  %v402_v36 = vmov 920167782   ;;  %s369_s21 = scalar_lea.vmem %s308_s20, 1536  ;;  %p374_p9 = scmp.lt.s32.totalorder %s308_s20, %s308_s20 }
  0x17   :  { %v444_v10 = vadd.f32 %v36_v5, %v35_v4  ;;  %v446_v11 = vadd.f32 %v36_v5, %v34_v3  ;;  %v403_v43 = vmov 1326507024   ;;  %p370_p8 = scmp.ne.s32.totalorder %s308_s20, %s369_s21  ;;  %p375_p10 = scmp.lt.s32.totalorder %s369_s21, %s369_s21 }
  0x18   :  { %v41_v12 = vadd.f32 %v442_v9, %v36_v5 }
  0x19   :  { %p376_p11 = por %p375_p10, %p374_p9 }
  0x1a   :  { %v42_v13 = vadd.f32 1e-30, %v41_v12 }
  0x1b   :  { %p377_p12 = pnand %p376_p11, %p370_p8 }
  0x1c   :  { %341 = vrsqrt.f32 %v42_v13 }
  0x26   :  { %v449_v14 = vpop.eup %341 }
  0x27   :  { %v45_v15 = vmul.f32 %v449_v14, %v41_v12 }
  0x29   :  { %v452_v16 = vmul.f32 0.5, %v45_v15 }
  0x2b   :  { %v50_v17 = vand.u32 2139095040, %v452_v16  ;;  %v47_v19 = vand.u32 2147483647, %v452_v16  ;;  %vm49_vm7 = vcmp.lt.s32.totalorder %v452_v16, 0  ;;  %vm139_vm15 = vweird.f32 %v452_v16 }
  0x2d   :  { %v51_v18 = vshrl.u32 %v50_v17, 23  ;;  %v54_v22 = vand.u32 8388607, %v47_v19  ;;  %vm48_vm8 = vcmp.le.f32.partialorder %v47_v19, 0.7853982 }
  0x2f   :  { %v319_v20 = vadd.s32 4294967169, %v51_v18  ;;  %v55_v25 = vor.u32 8388608, %v54_v22 }
  0x31   :  { %v57_v21 = vadd.s32 1, %v319_v20  ;;  %v95_v45 = vshll.u32 %v55_v25, 8 }
  0x33   :  { %vm58_vm0 = vcmp.gt.s32.totalorder %v57_v21, 0 }
  0x34   :  { %v59_v23 = vsel %vm58_vm0, %v57_v21, 0 }
  0x35   :  { %v61_v24 = vand.u32 31, %v59_v23  ;;  %v60_v26 = vshrl.u32 %v59_v23, 5 }
  0x37   :  { %v62_v27 = vsub.s32 32, %v61_v24  ;;  %v64_v29 = vshll.u32 %v398_v28, %v61_v24  ;;  %v67_v31 = vshll.u32 %v399_v30, %v61_v24  ;;  %v70_v33 = vshll.u32 %v400_v32, %v61_v24 }
  0x38   :  { %v73_v35 = vshll.u32 %v401_v34, %v61_v24  ;;  %v76_v37 = vshll.u32 %v402_v36, %v61_v24  ;;  %vm79_vm1 = vcmp.lt.s32.totalorder %v60_v26, 1  ;;  %vm82_vm2 = vcmp.lt.s32.totalorder %v60_v26, 4 }
  0x39   :  { %v63_v38 = vshrl.u32 %v398_v28, %v62_v27  ;;  %v65_v39 = vshrl.u32 %v399_v30, %v62_v27  ;;  %v68_v40 = vshrl.u32 %v400_v32, %v62_v27  ;;  %v71_v41 = vshrl.u32 %v401_v34, %v62_v27 }
  0x3a   :  { %v74_v42 = vshrl.u32 %v402_v36, %v62_v27  ;;  %v77_v44 = vshrl.u32 %v403_v43, %v62_v27  ;;  %vm80_vm3 = vcmp.lt.s32.totalorder %v60_v26, 2  ;;  %vm81_vm4 = vcmp.lt.s32.totalorder %v60_v26, 3 }
  0x3b   :  { %v66_v46 = vor.u32 %v65_v39, %v64_v29  ;;  %v69_v47 = vor.u32 %v68_v40, %v67_v31  ;;  %v72_v48 = vor.u32 %v71_v41, %v70_v33 }
  0x3c   :  { %v75_v49 = vor.u32 %v74_v42, %v73_v35  ;;  %v78_v50 = vor.u32 %v77_v44, %v76_v37 }
  0x3d   :  { %v83_v51 = vsel %vm79_vm1, %v63_v38, %v66_v46  ;;  %v84_v52 = vsel %vm82_vm2, %v72_v48, 2102212464  ;;  %v87_v53 = vsel %vm79_vm1, %v66_v46, %v69_v47  ;;  %v91_v54 = vsel %vm79_vm1, %v69_v47, %v72_v48 }
  0x3e   :  { %v85_v55 = vsel %vm81_vm4, %v69_v47, %v84_v52  ;;  %v88_v56 = vsel %vm82_vm2, %v75_v49, 920167782  ;;  %v92_v57 = vsel %vm82_vm2, %v78_v50, 1326507024 }
  0x3f   :  { %v89_v58 = vsel %vm81_vm4, %v72_v48, %v88_v56  ;;  %v93_v59 = vsel %vm81_vm4, %v75_v49, %v92_v57  ;;  %v86_v60 = vsel %vm80_vm3, %v83_v51, %v85_v55  ;;  %v44_v57 = vmul.f32 %v449_v14, %v449_v14 }
  0x40   :  { %v90_v61 = vsel %vm80_vm3, %v87_v53, %v89_v58  ;;  %v94_v62 = vsel %vm80_vm3, %v91_v54, %v93_v59  ;;  %v102_v6 = vmul.u32 %v95_v45, %v86_v60  ;;  %v37_v60 = vmul.f32 %v432_v1, %v430_v0 }
  0x41   :  { %v458_v63 = vmul.u32.u64.low %v95_v45, %v94_v62  ;;  %v459_v3 = vmul.u32.u64.high %v95_v45, %v94_v62, %v458_v63  ;;  %v461_v4 = vmul.u32.u64.low %v95_v45, %v90_v61  ;;  %v462_v5 = vmul.u32.u64.high %v95_v45, %v90_v61, %v461_v4 }
  0x42   :  { %v39_v62 = vmul.f32 %v434_v2, %v432_v1 }
  0x43   :  { %vm104_vm5 = vc.u32 %v459_v3, %v461_v4  ;;  %v105_v7 = vadd.s32 1, %v462_v5  ;;  %v103_v24 = vadd.s32 %v461_v4, %v459_v3 }
  0x45   :  { %v106_v8 = vsel %vm104_vm5, %v105_v7, %v462_v5 }
  0x46   :  { %v107_v12 = vadd.s32 %v106_v8, %v102_v6 }
  0x48   :  { %v108_v13 = vadd.s32 536870912, %v107_v12 }
  0x4a   :  { %v109_v15 = vshrl.u32 %v108_v13, 30 }
  0x4c   :  { %v110_v17 = vshll.u32 %v109_v15, 30  ;;  %v133_v36 = vsub.s32 4, %v109_v15 }
  0x4e   :  { %v111_v18 = vsub.s32 %v107_v12, %v110_v17  ;;  %v134_v39 = vsel %vm49_vm7, %v133_v36, %v109_v15 }
  0x4f   :  { %v136_v42 = vsel %vm48_vm8, 0, %v134_v39 }
  0x50   :  { %v113_v20 = vsub.s32 0, %v111_v18  ;;  %v140_v43 = vadd.s32 3, %v136_v42  ;;  %v244_v45 = vand.u32 3, %v136_v42 }
  0x52   :  { %v320_v21 = vmin.u32 %v113_v20, %v111_v18  ;;  %v141_v44 = vand.u32 3, %v140_v43  ;;  %vm249_vm10 = vcmp.eq.s32.totalorder %v244_v45, 2  ;;  %vm246_vm12 = vcmp.eq.s32.totalorder %v244_v45, 0 }
  0x53   :  { %vm245_vm14 = vcmp.lt.s32.totalorder %v244_v45, 2 }
  0x54   :  { %v115_v22 = vclz %v320_v21  ;;  %vm146_vm9 = vcmp.eq.s32.totalorder %v141_v44, 2  ;;  %vm143_vm11 = vcmp.eq.s32.totalorder %v141_v44, 0  ;;  %vm142_vm13 = vcmp.lt.s32.totalorder %v141_v44, 2 }
  0x56   :  { %v321_v23 = vadd.s32 4294967294, %v115_v22 }
  0x58   :  { %vm322_vm6 = vcmp.lt.s32.totalorder %v321_v23, 0 }
  0x59   :  { %v118_v25 = vsel %vm322_vm6, 0, %v321_v23 }
  0x5a   :  { %v119_v26 = vsub.s32 32, %v118_v25  ;;  %v120_v27 = vshll.u32 %v111_v18, %v118_v25  ;;  %v123_v28 = vsub.s32 4294967266, %v118_v25 }
  0x5c   :  { %v121_v29 = vshrl.u32 %v103_v24, %v119_v26  ;;  %v124_v30 = vadd.s32 127, %v123_v28 }
  0x5e   :  { %v122_v31 = vor.u32 %v121_v29, %v120_v27  ;;  %v125_v32 = vshll.u32 %v124_v30, 23 }
  0x60   :  { %v126_v33 = vor.u32 4788187, %v125_v32  ;;  %v129_v34 = vcvt.s32.f32 %v122_v31 }
  0x62   :  { %v127_v35 = vand.u32 2147483647, %v126_v33 }
  0x64   :  { %v130_v37 = vmul.f32 %v129_v34, %v127_v35 }
  0x66   :  { %v131_v38 = vxor.u32 2147483648, %v130_v37 }
  0x68   :  { %v132_v40 = vsel %vm49_vm7, %v131_v38, %v130_v37 }
  0x69   :  { %v135_v41 = vsel %vm48_vm8, %v452_v16, %v132_v40  ;;  %v38_v16 = vmul.f32 %v434_v2, %v430_v0 }
  0x6a   :  { %343 = vcosq.f32 %v135_v41 }
  0x6b   :  { %345 = vsinq.f32 %v135_v41 }
  0x74   :  { %v344_v46 = vpop.eup %343 }
  0x75   :  { %v346_v47 = vpop.eup %345  ;;  %v147_v48 = vxor.u32 2147483648, %v344_v46 }
  0x76   :  { %v144_v19 = vxor.u32 2147483648, %v346_v47 }
  0x77   :  { %v148_v49 = vsel %vm146_vm9, %v147_v48, %v346_v47  ;;  %v251_v50 = vsel %vm249_vm10, %v147_v48, %v346_v47 }
  0x78   :  { %v145_v51 = vsel %vm143_vm11, %v344_v46, %v144_v19  ;;  %v248_v52 = vsel %vm246_vm12, %v344_v46, %v144_v19 }
  0x79   :  { %v149_v53 = vsel %vm142_vm13, %v145_v51, %v148_v49  ;;  %v252_v54 = vsel %vm245_vm14, %v248_v52, %v251_v50 }
  0x7a   :  { %v150_v55 = vsel %vm139_vm15, nan, %v149_v53  ;;  %v253_v56 = vsel %vm139_vm15, nan, %v252_v54 }
  0x7b   :  { %v254_v58 = vmul.f32 2.0, %v150_v55 }
  0x7d   :  { %v257_v59 = vmul.f32 %v254_v58, %v150_v55  ;;  %v255_v61 = vmul.f32 %v254_v58, %v253_v56 }
  0x7f   :  { %v258_v63 = vmul.f32 %v257_v59, %v44_v57  ;;  %v256_v3 = vmul.f32 %v449_v14, %v255_v61 }
  0x81   :  { %v266_v4 = vmul.f32 %v444_v10, %v258_v63  ;;  %v261_v5 = vmul.f32 %v256_v3, %v434_v2  ;;  %v262_v6 = vmul.f32 %v258_v63, %v37_v60  ;;  %v260_v7 = vmul.f32 %v256_v3, %v432_v1 }
  0x82   :  { %v263_v8 = vmul.f32 %v258_v63, %v38_v16  ;;  %v281_v12 = vmul.f32 %v446_v11, %v258_v63  ;;  %v259_v13 = vmul.f32 %v256_v3, %v430_v0  ;;  %v264_v15 = vmul.f32 %v258_v63, %v39_v62 }
  0x83   :  { %v267_v17 = vsub.f32 1.0, %v266_v4  ;;  %v269_v18 = vsub.f32 %v262_v6, %v261_v5  ;;  %v277_v20 = vadd.f32 %v262_v6, %v261_v5  ;;  %v296_v14 = vmul.f32 %v258_v63, %v442_v9 }
  0x84   :  { %v272_v21 = vadd.f32 %v263_v8, %v260_v7  ;;  %v282_v10 = vsub.f32 1.0, %v281_v12  ;;  %v285_v22 = vsub.f32 %v264_v15, %v259_v13  ;;  %v290_v2 = vsub.f32 %v263_v8, %v260_v7 }
  0x85   :  { %268 = vst [vmem:[#allocation5] sm:$0xff] %v267_v17  ;;  %271 = vst [vmem:[#allocation5 + $0x8] sm:$0xff] %v269_v18  ;;  %v293_v1 = vadd.f32 %v264_v15, %v259_v13  ;;  %v297_v23 = vsub.f32 1.0, %v296_v14 }
  0x86   :  { %279 = vst [vmem:[#allocation5 + $0x20] sm:$0xff] %v277_v20  ;;  %274 = vst [vmem:[#allocation5 + $0x10] sm:$0xff] %v272_v21 }
  0x87   :  { %284 = vst [vmem:[#allocation5 + $0x28] sm:$0xff] %v282_v10  ;;  %287 = vst [vmem:[#allocation5 + $0x30] sm:$0xff] %v285_v22 }
  0x88   :  { %292 = vst [vmem:[#allocation5 + $0x40] sm:$0xff] %v290_v2  ;;  %295 = vst [vmem:[#allocation5 + $0x48] sm:$0xff] %v293_v1 }
  0x89   :  { %299 = vst [vmem:[#allocation5 + $0x50] sm:$0xff] %v297_v23 }
  0x8a   :  { %380 = shalt.err (!%p377_p12)
}
  0x8b   :  { %s381_s24 = scalar_lea.hbm %s504_s1, 1536 }
  0x8c   :  { %p382_p13 = scmp.ne.s32.totalorder %s504_s1, %s381_s24  ;;  %p385_p0 = scmp.lt.u32.totalorder %s381_s24, %s504_s1 }
  0x8e   :  { %p387_p1 = pnand %p385_p0, %p382_p13 }
  0x90   :  { %390 = shalt.err (!%p387_p1)
}
  0x91   :  { %313 = dma.vmem_to_hbm [thread:$0]  %s308_s20, 1536, %s504_s1, [#allocation4], %s396_s16, %s396_s16, %s397_s17  }
  0x92   :  { %393 = dma.done.wait [#allocation4], 1536  }
  0x93   :  { %394 = vsyncadd [#allocation4], 4294965760 }
  0x94   :  { %317 = vsyncpa [#allocation3], 1 }
  0x95   :  { %318 = vsyncpa [#allocation4], 1 }

</bundles_post_ra>
